<compile_context>
chip_gen: v5e
topology: v5e:2x2
jax: 0.10.0
libtpu: 0.0.40
codegen_flags: <defaults>
</compile_context>

<pallas_src>
import functools

import jax
import jax.numpy as jnp
from jax.experimental import pallas as pl
from jax.experimental.pallas import tpu as pltpu


def _sparsity_kernel(mask_ref, x_ref, o_ref, *, HW, W, N, batch_tile,
                     need_row_mask):
    # Block layout: (batch_tile, 2*HW) with channel 0 in the first HW lanes
    # of each row and channel 1 in the last HW lanes.
    xw = x_ref[...].astype(jnp.float32)
    x0 = xw[:, :HW]
    x1 = xw[:, HW:]

    # ||x||_2 over the channel pair (VPU mul/add + EUP sqrt).
    acc = jnp.sqrt(x0 * x0 + x1 * x1)

    mask_dy = mask_ref[0:1, :]            # (1, HW) {0,1} float masks
    mask_dx = mask_ref[1:2, :]

    # Vertical forward difference via one merged XLU rotation on the whole
    # row:  roll(xw, 2HW-W)[:, i] == xw[:, (i+W) % 2HW].  The wrap /
    # channel-crossing lanes land exactly on the (masked) last image row.
    xr = pltpu.roll(xw, shift=2 * HW - W, axis=1)
    d0 = xr[:, :HW] - x0
    d1 = xr[:, HW:] - x1
    acc = acc + jnp.sqrt(d0 * d0 + d1 * d1) * mask_dy

    # Horizontal forward difference: roll(xw, 2HW-1)[:, i] == xw[:, (i+1) % 2HW].
    # Wrap / channel-crossing lanes land on the (masked) last image column.
    xr = pltpu.roll(xw, shift=2 * HW - 1, axis=1)
    d0 = xr[:, :HW] - x0
    d1 = xr[:, HW:] - x1
    acc = acc + jnp.sqrt(d0 * d0 + d1 * d1) * mask_dx

    if need_row_mask:
        # The last block may extend past N rows; zero its invalid sublanes
        # (jnp.where selects, so stale/NaN data in those rows is harmless).
        row = (jax.lax.broadcasted_iota(jnp.int32, acc.shape, 0)
               + pl.program_id(0) * batch_tile)
        acc = jnp.where(row < N, acc, 0.0)

    # One cheap per-block cross-lane reduce; broadcast to a lane/sublane
    # aligned (8, 128) tile so the output store is a plain full-tile vst.
    o_ref[...] = jnp.full((1, 8, 128), jnp.sum(acc), dtype=jnp.float32)


def sparsity_criterion(x, *, batch_tile=None, target_block_bytes=2 << 20):
    """Pallas implementation of SparsityCriterion.forward.  x: [N, 2, H, W]."""
    N, C, H, W = x.shape
    assert C == 2, "SparsityCriterion expects exactly 2 channels"
    HW = H * W
    inv_denom = 1.0 / float(N * HW)       # same denominator for all 3 means

    # Free, contiguous reshape: one image per row, lane-dense last dim.
    xf = x.reshape(N, C * HW)

    itemsize = jnp.dtype(x.dtype).itemsize
    sublane = max(8, 32 // itemsize)       # 8 for f32, 16 for bf16, 32 for i8
    per_image_bytes = C * HW * itemsize

    if batch_tile is None:
        cap = max(1, target_block_bytes // per_image_bytes)
        batch_tile = max(sublane, (cap // sublane) * sublane)
    # Sublane-align user-supplied tiles (or use the full batch) so the block
    # satisfies the (8,128) divisibility rule.
    if batch_tile != N and batch_tile % sublane:
        batch_tile = ((batch_tile + sublane - 1) // sublane) * sublane
    # Never use a block taller than the (sublane-floored) batch.
    bt_cap = N if N <= sublane else (N // sublane) * sublane
    batch_tile = max(1, min(batch_tile, bt_cap))

    grid = pl.cdiv(N, batch_tile)
    need_row_mask = grid * batch_tile > N   # partial last block -> mask rows

    # Masks for the zero-padded last row (dy) / last column (dx); also zero
    # the wrap-around lanes introduced by the merged rolls.  Built once here.
    pos = jnp.arange(HW, dtype=jnp.int32)
    mask_dy = (pos < (H - 1) * W).astype(jnp.float32)
    mask_dx = ((pos % W) < (W - 1)).astype(jnp.float32)
    masks = jnp.stack([mask_dy, mask_dx], axis=0)            # (2, HW)

    # VMEM budget: double-buffered input block + ~6 f32 (bt, HW) temporaries.
    block_in_bytes = batch_tile * C * HW * itemsize
    vmem_est = 2 * block_in_bytes + 6 * batch_tile * HW * 4 + (1 << 20)
    vmem_limit = int(min(64 << 20, max(32 << 20, vmem_est)))  # v7x-safe cap

    kernel = functools.partial(
        _sparsity_kernel, HW=HW, W=W, N=N,
        batch_tile=batch_tile, need_row_mask=need_row_mask)

    partials = pl.pallas_call(
        kernel,
        out_shape=jax.ShapeDtypeStruct((grid, 8, 128), jnp.float32),
        grid=(grid,),
        in_specs=[
            # Constant index_map -> fetched once, stays VMEM resident.
            pl.BlockSpec((2, HW), lambda b: (0, 0)),
            pl.BlockSpec((batch_tile, C * HW), lambda b: (b, 0)),
        ],
        out_specs=pl.BlockSpec((1, 8, 128), lambda b: (b, 0, 0)),
        compiler_params=pltpu.CompilerParams(
            dimension_semantics=("parallel",),
            vmem_limit_bytes=vmem_limit,
        ),
    )(masks, xf)

    # Tiny final reduce over the per-block partial sums (done in XLA).
    return jnp.sum(partials[:, 0, 0]) * inv_denom


def sparsity_criterion_ref(x):
    """Pure-JAX reference matching the PyTorch module."""
    x = x.astype(jnp.float32)
    dy = jnp.zeros_like(x).at[:, :, :-1, :].set(
        x[:, :, 1:, :] - x[:, :, :-1, :])
    dx = jnp.zeros_like(x).at[:, :, :, :-1].set(
        x[:, :, :, 1:] - x[:, :, :, :-1])
    nx = jnp.sqrt(jnp.sum(x * x, axis=1)).mean()
    ndy = jnp.sqrt(jnp.sum(dy * dy, axis=1)).mean()
    ndx = jnp.sqrt(jnp.sum(dx * dx, axis=1)).mean()
    return nx + ndy + ndx


if __name__ == "__main__":
    key = jax.random.PRNGKey(0)
    # [N, 2, H, W] — the module asserts exactly 2 channels.
    x = jax.random.normal(key, (16, 2, 16, 16), dtype=jnp.float32)

    # 1) default tiling (single block).
    ref = jax.block_until_ready(sparsity_criterion_ref(x))
    out_a = jax.block_until_ready(sparsity_criterion(x))
    assert jnp.allclose(out_a, ref, rtol=1e-4, atol=1e-5), (
        f"mismatch (default tiling): pallas={out_a} ref={ref}")

    # 2) forced multi-block tiling: exercises parallel per-block partials.
    out_b = jax.block_until_ready(sparsity_criterion(x, batch_tile=8))
    assert jnp.allclose(out_b, ref, rtol=1e-4, atol=1e-5), (
        f"mismatch (batch_tile=8): pallas={out_b} ref={ref}")

    # 3) batch not a multiple of the tile: exercises the in-kernel row mask
    #    (no jnp.pad of the input).
    x13 = x[:13]
    ref13 = jax.block_until_ready(sparsity_criterion_ref(x13))
    out_c = jax.block_until_ready(sparsity_criterion(x13, batch_tile=8))
    assert jnp.allclose(out_c, ref13, rtol=1e-4, atol=1e-5), (
        f"mismatch (N=13, batch_tile=8): pallas={out_c} ref={ref13}")

    # 4) bf16 input (halves HBM traffic; compute stays f32 in-register).
    xb = x.astype(jnp.bfloat16)
    refb = jax.block_until_ready(sparsity_criterion_ref(xb))
    out_d = jax.block_until_ready(sparsity_criterion(xb))
    assert jnp.allclose(out_d, refb, rtol=1e-3, atol=1e-4), (
        f"mismatch (bf16): pallas={out_d} ref={refb}")

    print("KERNEL_OK")
</pallas_src>

<mosaic_0001>
module attributes {stable_mosaic.version = 11 : i64} {
  func.func @_sparsity_kernel(%arg0: i32, %arg1: memref<2x256xf32, #tpu.memory_space<vmem>>, %arg2: memref<16x512xf32, #tpu.memory_space<vmem>>, %arg3: memref<1x8x128xf32, #tpu.memory_space<vmem>>) attributes {dimension_semantics = [#tpu.dimension_semantics<parallel>], iteration_bounds = array<i64: 1>, scalar_prefetch = 0 : i64, scratch_operands = 0 : i64, tpu.core_type = #tpu.core_type<tc>, window_params = [{pipeline_mode = #tpu.pipeline_mode<synchronous>, transform_indices = @transform_0, window_bounds = array<i64: 2, 256>}, {transform_indices = @transform_1, window_bounds = array<i64: 16, 512>}, {transform_indices = @transform_2, window_bounds = array<i64: 1, 8, 128>}]} {
    %c0 = arith.constant 0 : index
    %c0_0 = arith.constant 0 : index
    %0 = vector.load %arg2[%c0, %c0_0] : memref<16x512xf32, #tpu.memory_space<vmem>>, vector<16x512xf32>
    %1 = vector.extract_strided_slice %0 {offsets = [0, 0], sizes = [16, 256], strides = [1, 1]} : vector<16x512xf32> to vector<16x256xf32>
    %2 = vector.extract_strided_slice %0 {offsets = [0, 256], sizes = [16, 256], strides = [1, 1]} : vector<16x512xf32> to vector<16x256xf32>
    %3 = arith.mulf %1, %1 : vector<16x256xf32>
    %4 = arith.mulf %2, %2 : vector<16x256xf32>
    %5 = arith.addf %3, %4 : vector<16x256xf32>
    %6 = math.sqrt %5 : vector<16x256xf32>
    %c0_1 = arith.constant 0 : index
    %c0_2 = arith.constant 0 : index
    %7 = vector.load %arg1[%c0_1, %c0_2] : memref<2x256xf32, #tpu.memory_space<vmem>>, vector<1x256xf32>
    %c1 = arith.constant 1 : index
    %c0_3 = arith.constant 0 : index
    %8 = vector.load %arg1[%c1, %c0_3] : memref<2x256xf32, #tpu.memory_space<vmem>>, vector<1x256xf32>
    %c496_i32 = arith.constant 496 : i32
    %9 = tpu.dynamic_rotate %0 by %c496_i32 dim 1 : vector<16x512xf32>, i32 -> vector<16x512xf32>
    %10 = vector.extract_strided_slice %9 {offsets = [0, 0], sizes = [16, 256], strides = [1, 1]} : vector<16x512xf32> to vector<16x256xf32>
    %11 = arith.subf %10, %1 : vector<16x256xf32>
    %12 = vector.extract_strided_slice %9 {offsets = [0, 256], sizes = [16, 256], strides = [1, 1]} : vector<16x512xf32> to vector<16x256xf32>
    %13 = arith.subf %12, %2 : vector<16x256xf32>
    %14 = arith.mulf %11, %11 : vector<16x256xf32>
    %15 = arith.mulf %13, %13 : vector<16x256xf32>
    %16 = arith.addf %14, %15 : vector<16x256xf32>
    %17 = math.sqrt %16 : vector<16x256xf32>
    %18 = vector.broadcast %7 : vector<1x256xf32> to vector<16x256xf32>
    %19 = arith.mulf %17, %18 : vector<16x256xf32>
    %20 = arith.addf %6, %19 : vector<16x256xf32>
    %c511_i32 = arith.constant 511 : i32
    %21 = tpu.dynamic_rotate %0 by %c511_i32 dim 1 : vector<16x512xf32>, i32 -> vector<16x512xf32>
    %22 = vector.extract_strided_slice %21 {offsets = [0, 0], sizes = [16, 256], strides = [1, 1]} : vector<16x512xf32> to vector<16x256xf32>
    %23 = arith.subf %22, %1 : vector<16x256xf32>
    %24 = vector.extract_strided_slice %21 {offsets = [0, 256], sizes = [16, 256], strides = [1, 1]} : vector<16x512xf32> to vector<16x256xf32>
    %25 = arith.subf %24, %2 : vector<16x256xf32>
    %26 = arith.mulf %23, %23 : vector<16x256xf32>
    %27 = arith.mulf %25, %25 : vector<16x256xf32>
    %28 = arith.addf %26, %27 : vector<16x256xf32>
    %29 = math.sqrt %28 : vector<16x256xf32>
    %30 = vector.broadcast %8 : vector<1x256xf32> to vector<16x256xf32>
    %31 = arith.mulf %29, %30 : vector<16x256xf32>
    %32 = arith.addf %20, %31 : vector<16x256xf32>
    %33 = vector.shape_cast %32 : vector<16x256xf32> to vector<1x16x256xf32>
    %cst = arith.constant dense<0.000000e+00> : vector<1xf32>
    %34 = vector.multi_reduction <add>, %33, %cst [1, 2] : vector<1x16x256xf32> to vector<1xf32>
    %35 = vector.shape_cast %34 : vector<1xf32> to vector<1x1x1xf32>
    %36 = vector.extract %35[0, 0, 0] : f32 from vector<1x1x1xf32>
    %37 = vector.broadcast %36 : f32 to vector<1x8x128xf32>
    %c0_4 = arith.constant 0 : index
    %c0_5 = arith.constant 0 : index
    %c0_6 = arith.constant 0 : index
    %38 = vector.load %arg3[%c0_4, %c0_5, %c0_6] : memref<1x8x128xf32, #tpu.memory_space<vmem>>, vector<1x8x128xf32>
    tpu.vector_store %arg3[%c0_4, %c0_5, %c0_6], %37 {strides = array<i32>} : memref<1x8x128xf32, #tpu.memory_space<vmem>>, vector<1x8x128xf32>,
    return
  }
  func.func @transform_0(%arg0: i32) -> (i32, i32) {
    %c0_i32 = arith.constant 0 : i32
    %c0_i32_0 = arith.constant 0 : i32
    %c0_i32_1 = arith.constant 0 : i32
    return %c0_i32, %c0_i32_0 : i32, i32
  }
  func.func @transform_1(%arg0: i32) -> (i32, i32) {
    %c0_i32 = arith.constant 0 : i32
    %c0_i32_0 = arith.constant 0 : i32
    return %arg0, %c0_i32 : i32, i32
  }
  func.func @transform_2(%arg0: i32) -> (i32, i32, i32) {
    %c0_i32 = arith.constant 0 : i32
    %c0_i32_0 = arith.constant 0 : i32
    %c0_i32_1 = arith.constant 0 : i32
    return %arg0, %c0_i32, %c0_i32_0 : i32, i32, i32
  }
}

</mosaic_0001>

<bundles_post_ra>
// kernel: tpu_custom_call.1
= control target key start
LH: loop header
LB: loop body
LE: loop exit
PB: predicated region body
PF: predicated region fallthrough
CT: control target
= control target key end

     0   :  { %7 = vsyncpa [#allocation3], 0  ;;  %s792_s0 = inlined_call_operand.hbm [shape: f32[2,256], index: 0, kind: input, shape index: {}]   ;;  %s793_s1 = inlined_call_operand.hbm [shape: f32[16,512], index: 1, kind: input, shape index: {}]   ;;  %s794_s2 = inlined_call_operand.hbm [shape: f32[1,8,128], index: 2, kind: output, shape index: {}]  }
   0x1   :  { %8 = vsyncpa [#allocation6], 0 }
   0x2   :  { %9 = vsyncpa [#allocation4], 0  ;;  %s15_s11 = sshll.u32 %s792_s0, 4  ;;  %s470_s12 = smov [#allocation2]   ;;  %s16_s11 = int_to_ptr.hbm [resolvable:$true] %s15_s11 }
   0x3   :  { %s17_s13 = sshll.u32 %s470_s12, 4  ;;  %s25_s16 = sshll.u32 %s793_s1, 4  ;;  %s18_s13 = int_to_ptr.vmem [resolvable:$true] %s17_s13  ;;  %s26_s16 = int_to_ptr.hbm [resolvable:$true] %s25_s16 }
   0x4   :  { %20 = dma.hbm_to_vmem [thread:$0]  %s16_s11, 64, %s18_s13, [#allocation3]  }
   0x5   :  { %s471_s17 = smov [#allocation5]   ;;  %s472_s19 = smov 512  }
   0x6   :  { %s27_s18 = sshll.u32 %s471_s17, 4  ;;  %s473_s20 = smov 32   ;;  %s28_s18 = int_to_ptr.vmem [resolvable:$true] %s27_s18 }
   0x7   :  { %33 = dma.hbm_to_vmem [thread:$0]  %s26_s16, 1024, %s28_s18, [#allocation6], %s472_s19, %s472_s19, %s473_s20  }
   0x8   :  { %464 = dma.done.wait [#allocation3], 64  }
   0x9   :  { %465 = vsyncadd [#allocation3], 4294967232 }
   0xa   :  { %466 = dma.done.wait [#allocation6], 1024  }
   0xb   :  { %467 = vsyncadd [#allocation6], 4294966272  ;;  %v498_v0 = vld [vmem:[#allocation5 + $0x10] sm:$0xff]  ;;  %v500_v1 = vld [vmem:[#allocation5] sm:$0xff]  ;;  %s474_s0 = smov 112   ;;  %s475_s1 = smov 127   ;;  %v129_v15 = vlaneseq }
   0xc   :  { %121 = vrot.lane.b32.xlu1 %v498_v0, %s474_s0  ;;  %113 = vrot.lane.b32.xlu0 %v500_v1, %s474_s0  ;;  %v504_v2 = vld [vmem:[#allocation5 + $0x20] sm:$0xff]  ;;  %v507_v3 = vld [vmem:[#allocation5 + $0x18] sm:$0xff]  ;;  %v509_v4 = vld [vmem:[#allocation5 + $0x8] sm:$0xff]  ;;  %v54_v9 = vmul.f32 %v498_v0, %v498_v0  ;;  %v50_v10 = vmul.f32 %v500_v1, %v500_v1  ;;  %s348_s23 = sshll.u32 %s794_s2, 4  ;;  %s476_s24 = smov [#allocation7]   ;;  %s349_s23 = int_to_ptr.hbm [resolvable:$true] %s348_s23 }
   0xd   :  { %115 = vrot.lane.b32.xlu2 %v504_v2, %s474_s0  ;;  %v511_v5 = vld [vmem:[#allocation5 + $0x28] sm:$0xff]  ;;  %v516_v6 = vld [vmem:[#allocation5 + $0x38] sm:$0xff]  ;;  %v518_v7 = vld [vmem:[#allocation5 + $0x30] sm:$0xff]  ;;  %v55_v13 = vmul.f32 %v507_v3, %v507_v3  ;;  %v51_v14 = vmul.f32 %v509_v4, %v509_v4  ;;  %v543_v19 = vand.u32 127, %v129_v15  ;;  %v52_v23 = vmul.f32 %v504_v2, %v504_v2  ;;  %s346_s25 = sshll.u32 %s476_s24, 4  ;;  %s347_s25 = int_to_ptr.vmem [resolvable:$true] %s346_s25 }
   0xe   :  { %v534_v12 = vadd.f32 %v54_v9, %v50_v10  ;;  %v56_v22 = vmul.f32 %v518_v7, %v518_v7  ;;  %v57_v26 = vmul.f32 %v516_v6, %v516_v6  ;;  %v53_v39 = vmul.f32 %v511_v5, %v511_v5 }
   0xf   :  { %v540_v16 = vadd.f32 %v55_v13, %v51_v14  ;;  %vm131_vm0 = vcmp.lt.s32.totalorder %v543_v19, 112  ;;  %vm237_vm1 = vcmp.lt.s32.totalorder %v543_v19, 127 }
  0x10   :  { %368 = vrsqrt.f32 %v534_v12  ;;  %v572_v38 = vadd.f32 %v56_v22, %v52_v23  ;;  %v582_v49 = vadd.f32 %v57_v26, %v53_v39  ;;  %vm69_vm2 = vcmp.eq.f32.partialorder %v534_v12, inf }
  0x11   :  { %370 = vrsqrt.f32 %v540_v16  ;;  %vm71_vm3 = vcmp.eq.f32.partialorder %v534_v12, 0.0  ;;  %vm81_vm4 = vcmp.eq.f32.partialorder %v540_v16, inf  ;;  %vm83_vm5 = vcmp.eq.f32.partialorder %v540_v16, 0.0 }
  0x12   :  { %372 = vrsqrt.f32 %v572_v38  ;;  %vm93_vm6 = vcmp.eq.f32.partialorder %v572_v38, inf  ;;  %vm95_vm10 = vcmp.eq.f32.partialorder %v572_v38, 0.0  ;;  %vm105_vm13 = vcmp.eq.f32.partialorder %v582_v49, inf }
  0x14   :  { %125 = vrot.lane.b32.xlu1 %v507_v3, %s474_s0  ;;  %117 = vrot.lane.b32.xlu0 %v509_v4, %s474_s0 }
  0x15   :  { %119 = vrot.lane.b32.xlu2 %v511_v5, %s474_s0 }
  0x16   :  { %v369_v21 = vpop.eup %368 }
  0x17   :  { %v63_v24 = vmul.f32 %v369_v21, %v534_v12  ;;  %v554_v25 = vpop.eup %370 }
  0x18   :  { %v75_v41 = vmul.f32 %v554_v25, %v540_v16 }
  0x19   :  { %v64_v40 = vmul.f32 %v369_v21, %v63_v24 }
  0x1a   :  { %v76_v51 = vmul.f32 %v554_v25, %v75_v41 }
  0x1b   :  { %v65_v50 = vmul.f32 0.5, %v64_v40 }
  0x1c   :  { %127 = vrot.lane.b32.xlu1 %v516_v6, %s474_s0  ;;  %123 = vrot.lane.b32.xlu0 %v518_v7, %s474_s0  ;;  %v77_v10 = vmul.f32 0.5, %v76_v51  ;;  %v72_v51 = vand.u32 2147483648, %v534_v12 }
  0x1d   :  { %221 = vrot.lane.b32.xlu2 %v500_v1, %s475_s1  ;;  %v66_v9 = vsub.f32 1.5, %v65_v50 }
  0x1e   :  { %v78_v26 = vsub.f32 1.5, %v77_v10 }
  0x1f   :  { %v67_v24 = vmul.f32 %v369_v21, %v66_v9 }
  0x24   :  { %229 = vrot.lane.b32.xlu1 %v498_v0, %s475_s1  ;;  %225 = vrot.lane.b32.xlu0 %v509_v4, %s475_s1 }
  0x25   :  { %233 = vrot.lane.b32.xlu2 %v507_v3, %s475_s1 }
  0x2c   :  { %227 = vrot.lane.b32.xlu1 %v511_v5, %s475_s1  ;;  %223 = vrot.lane.b32.xlu0 %v504_v2, %s475_s1 }
  0x2d   :  { %231 = vrot.lane.b32.xlu2 %v518_v7, %s475_s1 }
  0x34   :  { %235 = vrot.lane.b32.xlu0 %v516_v6, %s475_s1 }
  0x67   :  { %v116_v8 = vpop.permute.xlu2 %115 }
  0x6f   :  { %v120_v11 = vpop.permute.xlu2 %119 }
  0x70   :  { %v137_v27 = vsel %vm131_vm0, %v116_v8, %v120_v11 }
  0x71   :  { %v142_v46 = vsub.f32 %v137_v27, %v504_v2 }
  0x73   :  { %v150_v56 = vmul.f32 %v142_v46, %v142_v46 }
  0x77   :  { %v546_v20 = vpop.permute.xlu2 %221 }
  0x7e   :  { %v122_v17 = vpop.permute.xlu1 %121  ;;  %v114_v18 = vpop.permute.xlu0 %113 }
  0x7f   :  { %v234_v47 = vpop.permute.xlu2 %233 }
  0x80   :  { %v244_v55 = vsel %vm237_vm1, %v234_v47, %v546_v20 }
  0x81   :  { %v251_v63 = vsub.f32 %v244_v55, %v507_v3 }
  0x83   :  { %v259_v23 = vmul.f32 %v251_v63, %v251_v63  ;;  %v667_v63 = vld [vmem:[#allocation2] ss:$2 sm:$0x3] }
  0x86   :  { %v126_v28 = vpop.permute.xlu1 %125  ;;  %v118_v29 = vpop.permute.xlu0 %117 }
  0x87   :  { %v132_v30 = vsel %vm131_vm0, %v122_v17, %v126_v28  ;;  %v138_v31 = vsel %vm131_vm0, %v126_v28, %v114_v18  ;;  %v134_v32 = vsel %vm131_vm0, %v118_v29, %v122_v17  ;;  %v136_v33 = vsel %vm131_vm0, %v114_v18, %v118_v29 }
  0x88   :  { %v144_v34 = vsub.f32 %v132_v30, %v498_v0  ;;  %v145_v35 = vsub.f32 %v138_v31, %v507_v3  ;;  %v140_v36 = vsub.f32 %v136_v33, %v500_v1  ;;  %v141_v37 = vsub.f32 %v134_v32, %v509_v4 }
  0x8a   :  { %v152_v42 = vmul.f32 %v144_v34, %v144_v34  ;;  %v153_v43 = vmul.f32 %v145_v35, %v145_v35  ;;  %v148_v44 = vmul.f32 %v140_v36, %v140_v36  ;;  %v149_v45 = vmul.f32 %v141_v37, %v141_v37 }
  0x8c   :  { %v580_v48 = vadd.f32 %v152_v42, %v148_v44  ;;  %v586_v52 = vadd.f32 %v153_v43, %v149_v45 }
  0x8e   :  { %v128_v53 = vpop.permute.xlu1 %127  ;;  %v124_v54 = vpop.permute.xlu0 %123  ;;  %374 = vrsqrt.f32 %v580_v48  ;;  %vm167_vm7 = vcmp.eq.f32.partialorder %v580_v48, inf  ;;  %vm169_vm8 = vcmp.eq.f32.partialorder %v580_v48, 0.0  ;;  %vm179_vm9 = vcmp.eq.f32.partialorder %v586_v52, inf }
  0x8f   :  { %v139_v57 = vsel %vm131_vm0, %v128_v53, %v116_v8  ;;  %v133_v58 = vsel %vm131_vm0, %v124_v54, %v128_v53  ;;  %v135_v59 = vsel %vm131_vm0, %v120_v11, %v124_v54  ;;  %376 = vrsqrt.f32 %v582_v49  ;;  %v604_v11 = vpop.eup %372 }
  0x90   :  { %v147_v60 = vsub.f32 %v139_v57, %v516_v6  ;;  %v143_v61 = vsub.f32 %v135_v59, %v511_v5  ;;  %v146_v62 = vsub.f32 %v133_v58, %v518_v7  ;;  %378 = vrsqrt.f32 %v586_v52 }
  0x91   :  { %v87_v27 = vmul.f32 %v604_v11, %v572_v38  ;;  %vm181_vm11 = vcmp.eq.f32.partialorder %v586_v52, 0.0 }
  0x92   :  { %v155_v8 = vmul.f32 %v147_v60, %v147_v60  ;;  %v151_v13 = vmul.f32 %v143_v61, %v143_v61  ;;  %v154_v14 = vmul.f32 %v146_v62, %v146_v62 }
  0x93   :  { %v88_v40 = vmul.f32 %v604_v11, %v87_v27 }
  0x94   :  { %v606_v15 = vadd.f32 %v154_v14, %v150_v56  ;;  %v608_v17 = vadd.f32 %v155_v8, %v151_v13  ;;  %v610_v18 = vpop.eup %374 }
  0x95   :  { %v614_v28 = vpop.eup %376  ;;  %v161_v35 = vmul.f32 %v610_v18, %v580_v48  ;;  %v89_v50 = vmul.f32 0.5, %v88_v40 }
  0x96   :  { %v230_v22 = vpop.permute.xlu1 %229  ;;  %v226_v3 = vpop.permute.xlu0 %225  ;;  %380 = vrsqrt.f32 %v606_v15  ;;  %vm191_vm12 = vcmp.eq.f32.partialorder %v606_v15, inf  ;;  %vm203_vm14 = vcmp.eq.f32.partialorder %v608_v17, inf }
  0x97   :  { %v238_v29 = vsel %vm237_vm1, %v230_v22, %v234_v47  ;;  %v240_v30 = vsel %vm237_vm1, %v226_v3, %v230_v22  ;;  %v242_v31 = vsel %vm237_vm1, %v546_v20, %v226_v3  ;;  %v624_v32 = vpop.eup %378  ;;  %382 = vrsqrt.f32 %v608_v17  ;;  %v232_v47 = vpop.permute.xlu2 %231 }
  0x98   :  { %v250_v21 = vsub.f32 %v238_v29, %v498_v0  ;;  %v246_v33 = vsub.f32 %v242_v31, %v500_v1  ;;  %v247_v34 = vsub.f32 %v240_v30, %v509_v4  ;;  %v99_v20 = vmul.f32 %v614_v28, %v582_v49 }
  0x99   :  { %v173_v41 = vmul.f32 %v624_v32, %v586_v52  ;;  %v68_v1 = vmul.f32 %v67_v24, %v534_v12  ;;  %v79_v4 = vmul.f32 %v554_v25, %v78_v26  ;;  %v162_v44 = vmul.f32 %v610_v18, %v161_v35 }
  0x9a   :  { %v258_v36 = vmul.f32 %v250_v21, %v250_v21  ;;  %v254_v37 = vmul.f32 %v246_v33, %v246_v33  ;;  %v255_v39 = vmul.f32 %v247_v34, %v247_v34  ;;  %v100_v53 = vmul.f32 %v614_v28, %v99_v20 }
  0x9b   :  { %v174_v25 = vmul.f32 %v624_v32, %v173_v41  ;;  %v70_v55 = vsel %vm69_vm2, %v534_v12, %v68_v1  ;;  %v80_v56 = vmul.f32 %v79_v4, %v540_v16  ;;  %v163_v58 = vmul.f32 0.5, %v162_v44 }
  0x9c   :  { %v637_v42 = vadd.f32 %v258_v36, %v254_v37  ;;  %v639_v0 = vadd.f32 %v259_v23, %v255_v39  ;;  %v643_v43 = vpop.eup %380  ;;  %v90_v61 = vsub.f32 1.5, %v89_v50  ;;  %v101_v12 = vmul.f32 0.5, %v100_v53 }
  0x9d   :  { %v647_v45 = vpop.eup %382  ;;  %v185_v59 = vmul.f32 %v643_v43, %v606_v15  ;;  %v175_v9 = vmul.f32 0.5, %v174_v25  ;;  %v670_v13 = vsel %vm71_vm3, %v72_v51, %v70_v55  ;;  %v82_v14 = vsel %vm81_vm4, %v540_v16, %v80_v56 }
  0x9e   :  { %384 = vrsqrt.f32 %v637_v42  ;;  %v224_v46 = vpop.permute.xlu0 %223  ;;  %v228_v54 = vpop.permute.xlu1 %227  ;;  %v197_v60 = vmul.f32 %v647_v45, %v608_v17  ;;  %v84_v22 = vand.u32 2147483648, %v540_v16  ;;  %v164_v3 = vsub.f32 1.5, %v163_v58 }
  0x9f   :  { %386 = vrsqrt.f32 %v639_v0  ;;  %v241_v57 = vsel %vm237_vm1, %v228_v54, %v232_v47  ;;  %v243_v62 = vsel %vm237_vm1, %v224_v46, %v228_v54  ;;  %v186_v24 = vmul.f32 %v643_v43, %v185_v59 }
  0xa0   :  { %v249_v8 = vsub.f32 %v241_v57, %v511_v5  ;;  %v198_v26 = vmul.f32 %v647_v45, %v197_v60  ;;  %v248_v29 = vsub.f32 %v243_v62, %v504_v2  ;;  %v91_v31 = vmul.f32 %v604_v11, %v90_v61 }
  0xa1   :  { %v209_v5 = vperm.slane %v667_v63, 0  ;;  %v102_v35 = vsub.f32 1.5, %v101_v12  ;;  %v176_v36 = vsub.f32 1.5, %v175_v9  ;;  %v165_v11 = vmul.f32 %v610_v18, %v164_v3  ;;  %v713_v12 = vld [vmem:[#allocation2 + $0x1] ss:$2 sm:$0x3] }
  0xa2   :  { %v257_v37 = vmul.f32 %v249_v8, %v249_v8  ;;  %v187_v20 = vmul.f32 0.5, %v186_v24  ;;  %v199_v41 = vmul.f32 0.5, %v198_v26  ;;  %v256_v4 = vmul.f32 %v248_v29, %v248_v29 }
  0xa3   :  { %v92_v19 = vmul.f32 %v91_v31, %v572_v38  ;;  %v103_v18 = vmul.f32 %v614_v28, %v102_v35  ;;  %v177_v53 = vmul.f32 %v624_v32, %v176_v36  ;;  %v700_v57 = vsel %vm83_vm5, %v84_v22, %v82_v14 }
  0xa4   :  { %v385_v10 = vpop.eup %384  ;;  %v188_v25 = vsub.f32 1.5, %v187_v20  ;;  %v200_v54 = vsub.f32 1.5, %v199_v41  ;;  %v96_v58 = vand.u32 2147483648, %v572_v38  ;;  %v166_v59 = vmul.f32 %v165_v11, %v580_v48 }
  0xa5   :  { %v387_v23 = vpop.eup %386  ;;  %v267_v27 = vmul.f32 %v385_v10, %v637_v42  ;;  %v94_v60 = vsel %vm93_vm6, %v572_v38, %v92_v19  ;;  %v170_v16 = vand.u32 2147483648, %v580_v48  ;;  %v178_v61 = vmul.f32 %v177_v53, %v586_v52 }
  0xa6   :  { %v236_v30 = vpop.permute.xlu0 %235  ;;  %v279_v21 = vmul.f32 %v387_v23, %v639_v0  ;;  %v104_v62 = vmul.f32 %v103_v18, %v582_v49  ;;  %v189_v9 = vmul.f32 %v643_v43, %v188_v25  ;;  %v168_v8 = vsel %vm167_vm7, %v580_v48, %v166_v59 }
  0xa7   :  { %v239_v33 = vsel %vm237_vm1, %v232_v47, %v236_v30  ;;  %v245_v34 = vsel %vm237_vm1, %v236_v30, %v224_v46  ;;  %v268_v40 = vmul.f32 %v385_v10, %v267_v27  ;;  %v210_v46 = vperm.slane %v667_v63, 1 }
  0xa8   :  { %v252_v39 = vsub.f32 %v239_v33, %v518_v7  ;;  %v253_v2 = vsub.f32 %v245_v34, %v516_v6  ;;  %v280_v1 = vmul.f32 %v387_v23, %v279_v21  ;;  %v182_v14 = vand.u32 2147483648, %v586_v52 }
  0xa9   :  { %v269_v47 = vmul.f32 0.5, %v268_v40  ;;  %v194_v22 = vand.u32 2147483648, %v606_v15  ;;  %v180_v3 = vsel %vm179_vm9, %v586_v52, %v178_v61  ;;  %v206_v24 = vand.u32 2147483648, %v608_v17 }
  0xaa   :  { %v260_v44 = vmul.f32 %v252_v39, %v252_v39  ;;  %v261_v50 = vmul.f32 %v253_v2, %v253_v2  ;;  %v281_v51 = vmul.f32 0.5, %v280_v1  ;;  %v315_v26 = vperm.slane %v713_v12, 0 }
  0xab   :  { %v270_v55 = vsub.f32 1.5, %v269_v47  ;;  %v316_v27 = vperm.slane %v713_v12, 1  ;;  %v171_v30 = vsel %vm169_vm8, %v170_v16, %v168_v8  ;;  %v190_v31 = vmul.f32 %v189_v9, %v606_v15 }
  0xac   :  { %v691_v7 = vadd.f32 %v260_v44, %v256_v4  ;;  %v693_v6 = vadd.f32 %v261_v50, %v257_v37  ;;  %v282_v56 = vsub.f32 1.5, %v281_v51  ;;  %vm273_vm15 = vcmp.eq.f32.partialorder %v637_v42, inf }
  0xad   :  { %v271_v28 = vmul.f32 %v385_v10, %v270_v55  ;;  %v201_v10 = vmul.f32 %v647_v45, %v200_v54  ;;  %vm275_vm0 = vcmp.eq.f32.partialorder %v637_v42, 0.0  ;;  %vm285_vm1 = vcmp.eq.f32.partialorder %v639_v0, inf }
  0xae   :  { %388 = vrsqrt.f32 %v691_v7  ;;  %v283_v32 = vmul.f32 %v387_v23, %v282_v56  ;;  %v183_v35 = vsel %vm181_vm11, %v182_v14, %v180_v3  ;;  %v213_v39 = vmul.f32 %v209_v5, %v171_v30 }
  0xaf   :  { %390 = vrsqrt.f32 %v693_v6  ;;  %v272_v43 = vmul.f32 %v271_v28, %v637_v42  ;;  %v202_v21 = vmul.f32 %v201_v10, %v608_v17  ;;  %v276_v2 = vand.u32 2147483648, %v637_v42 }
  0xb0   :  { %v284_v45 = vmul.f32 %v283_v32, %v639_v0  ;;  %v288_v40 = vand.u32 2147483648, %v639_v0  ;;  %v192_v20 = vsel %vm191_vm12, %v606_v15, %v190_v31  ;;  %vm287_vm2 = vcmp.eq.f32.partialorder %v639_v0, 0.0 }
  0xb1   :  { %v274_v48 = vsel %vm273_vm15, %v637_v42, %v272_v43  ;;  %v204_v52 = vsel %vm203_vm14, %v608_v17, %v202_v21  ;;  %v214_v1 = vmul.f32 %v210_v46, %v183_v35  ;;  %vm107_vm3 = vcmp.eq.f32.partialorder %v582_v49, 0.0 }
  0xb2   :  { %v286_v36 = vsel %vm285_vm1, %v639_v0, %v284_v45  ;;  %v277_v4 = vsel %vm275_vm0, %v276_v2, %v274_v48  ;;  %vm193_vm4 = vcmp.eq.f32.partialorder %v606_v15, 0.0  ;;  %vm205_vm5 = vcmp.eq.f32.partialorder %v608_v17, 0.0 }
  0xb3   :  { %v289_v44 = vsel %vm287_vm2, %v288_v40, %v286_v36  ;;  %v108_v19 = vand.u32 2147483648, %v582_v49  ;;  %v195_v51 = vsel %vm193_vm4, %v194_v22, %v192_v20  ;;  %v207_v0 = vsel %vm205_vm5, %v206_v24, %v204_v52 }
  0xb4   :  { %v389_v23 = vpop.eup %388  ;;  %v97_v42 = vsel %vm95_vm10, %v96_v58, %v94_v60  ;;  %v319_v25 = vmul.f32 %v315_v26, %v277_v4  ;;  %v320_v54 = vmul.f32 %v316_v27, %v289_v44  ;;  %v106_v15 = vsel %vm105_vm13, %v582_v49, %v104_v62 }
  0xb5   :  { %v391_v29 = vpop.eup %390  ;;  %v291_v33 = vmul.f32 %v389_v23, %v691_v7  ;;  %v217_v17 = vadd.f32 %v213_v39, %v670_v13  ;;  %v218_v55 = vadd.f32 %v214_v1, %v700_v57  ;;  %v215_v59 = vmul.f32 %v209_v5, %v195_v51 }
  0xb6   :  { %v303_v34 = vmul.f32 %v391_v29, %v693_v6  ;;  %v216_v28 = vmul.f32 %v210_v46, %v207_v0  ;;  %vm297_vm6 = vcmp.eq.f32.partialorder %v691_v7, inf  ;;  %vm299_vm7 = vcmp.eq.f32.partialorder %v691_v7, 0.0 }
  0xb7   :  { %v292_v37 = vmul.f32 %v389_v23, %v291_v33  ;;  %v300_v58 = vand.u32 2147483648, %v691_v7  ;;  %vm309_vm8 = vcmp.eq.f32.partialorder %v693_v6, inf  ;;  %v312_v57 = vand.u32 2147483648, %v693_v6 }
  0xb8   :  { %v304_v11 = vmul.f32 %v391_v29, %v303_v34  ;;  %v323_v5 = vadd.f32 %v319_v25, %v217_v17  ;;  %v324_v60 = vadd.f32 %v320_v54, %v218_v55  ;;  %v109_v63 = vsel %vm107_vm3, %v108_v19, %v106_v15 }
  0xb9   :  { %v293_v41 = vmul.f32 0.5, %v292_v37  ;;  %vm311_vm9 = vcmp.eq.f32.partialorder %v693_v6, 0.0  ;;  %v219_v61 = vadd.f32 %v215_v59, %v97_v42  ;;  %v220_v10 = vadd.f32 %v216_v28, %v109_v63 }
  0xba   :  { %v305_v50 = vmul.f32 0.5, %v304_v11  ;;  %v327_v14 = vadd.f32 %v324_v60, %v323_v5 }
  0xbb   :  { %v294_v47 = vsub.f32 1.5, %v293_v41 }
  0xbc   :  { %v306_v18 = vsub.f32 1.5, %v305_v50 }
  0xbd   :  { %v295_v53 = vmul.f32 %v389_v23, %v294_v47 }
  0xbe   :  { %v307_v56 = vmul.f32 %v391_v29, %v306_v18 }
  0xbf   :  { %v296_v38 = vmul.f32 %v295_v53, %v691_v7 }
  0xc0   :  { %v308_v32 = vmul.f32 %v307_v56, %v693_v6 }
  0xc1   :  { %v298_v13 = vsel %vm297_vm6, %v691_v7, %v296_v38 }
  0xc2   :  { %v301_v46 = vsel %vm299_vm7, %v300_v58, %v298_v13  ;;  %v310_v16 = vsel %vm309_vm8, %v693_v6, %v308_v32 }
  0xc3   :  { %v313_v62 = vsel %vm311_vm9, %v312_v57, %v310_v16  ;;  %v321_v12 = vmul.f32 %v315_v26, %v301_v46 }
  0xc4   :  { %v322_v9 = vmul.f32 %v316_v27, %v313_v62 }
  0xc5   :  { %v325_v8 = vadd.f32 %v321_v12, %v219_v61 }
  0xc6   :  { %v326_v7 = vadd.f32 %v322_v9, %v220_v10 }
  0xc7   :  { %v328_v22 = vadd.f32 %v327_v14, %v325_v8 }
  0xc9   :  { %v329_v43 = vadd.f32 %v328_v22, %v326_v7 }
  0xcb   :  { %330 = vadd.xlane.f32.xlu1 %v329_v43 }
 0x13e   :  { %v331_v45 = vpop.xlane.xlu1 %330 }
 0x13f   :  { %v332_v23 = vrot.slane %v331_v45, 4 }
 0x141   :  { %v333_v49 = vadd.f32 %v332_v23, %v331_v45 }
 0x143   :  { %v334_v3 = vrot.slane %v333_v49, 2 }
 0x145   :  { %v335_v24 = vadd.f32 %v334_v3, %v333_v49 }
 0x147   :  { %v336_v29 = vrot.slane %v335_v24, 1 }
 0x149   :  { %v337_v30 = vadd.f32 %v336_v29, %v335_v24 }
 0x14b   :  { %359 = vpush %v337_v30 }
 0x17c   :  { %s360_s26 = spop %359 }
 0x17d   :  { %v339_v6 = vstv %s360_s26 }
 0x17e   :  { %340 = vst [vmem:[#allocation7] sm:$0xff] %v339_v6 }
 0x17f   :  { %351 = dma.vmem_to_hbm [thread:$0]  %s347_s25, 128, %s349_s23, [#allocation4]  }
 0x180   :  { %468 = dma.done.wait [#allocation4], 128  }
 0x181   :  { %469 = vsyncadd [#allocation4], 4294967168 }
 0x182   :  { %356 = vsyncpa [#allocation3], 1 }
 0x183   :  { %357 = vsyncpa [#allocation6], 1 }
 0x184   :  { %358 = vsyncpa [#allocation4], 1 }

</bundles_post_ra>
